<compile_context>
chip_gen: v7x
topology: tpu7x:2x2x1
jax: 0.10.0
libtpu: 0.0.40
codegen_flags: <defaults>
</compile_context>

<pallas_src>
import functools
import math

import jax
import jax.numpy as jnp
from jax.experimental import pallas as pl
from jax.experimental.pallas import tpu as pltpu

EPS = 1e-12  # F.normalize default eps


# ----------------------------------------------------------------------------
# Kernel 1: stand-in backbone (tiled GAP) + linear + PReLU + feature normalize.
# Grid: (batch blocks ["parallel"], spatial tiles ["arbitrary" reduction]).
# ----------------------------------------------------------------------------
def _backbone_head_kernel(x_ref, w_ref, b_ref, a_ref, hn_ref, acc_ref,
                          *, hw, tile_s):
    # x_ref: (TILE_B, C, TILE_S)   w_ref: (C, F) bf16   b_ref: (1, F) f32
    # a_ref: (1, 1) SMEM           hn_ref: (TILE_B, F) bf16
    # acc_ref: (TILE_B, C, 128) f32 scratch (lane-shaped partial sums)
    k = pl.program_id(1)
    num_k = pl.num_programs(1)
    nchunks = tile_s // 128
    num_k_static = -(-hw // tile_s)          # static cdiv
    ragged = (hw % tile_s) != 0              # static Python bool

    @pl.when(k == 0)
    def _init():
        acc_ref[...] = jnp.zeros_like(acc_ref)

    def _accum_full():
        # Statically unrolled 128-lane chunk accumulation (VALU, lane-dense).
        for j in range(nchunks):
            acc_ref[...] += x_ref[:, :, j * 128:(j + 1) * 128].astype(jnp.float32)

    if not ragged:
        _accum_full()
    else:
        pl.when(k < num_k - 1)(_accum_full)

        @pl.when(k == num_k - 1)
        def _accum_tail():
            tail_start = (num_k_static - 1) * tile_s
            for j in range(nchunks):
                valid = hw - (tail_start + j * 128)   # static per-chunk validity
                if valid <= 0:
                    break                              # chunk fully out of bounds
                chunk = x_ref[:, :, j * 128:(j + 1) * 128].astype(jnp.float32)
                if valid < 128:
                    lane = jax.lax.broadcasted_iota(jnp.int32, chunk.shape, 2)
                    chunk = jnp.where(lane < valid, chunk, 0.0)
                acc_ref[...] += chunk

    @pl.when(k == num_k - 1)
    def _finalize():
        # Single cross-lane reduce + true mean.
        pooled = jnp.sum(acc_ref[...], axis=-1) * (1.0 / hw)        # (TILE_B, C) f32
        feat = jnp.dot(pooled.astype(jnp.bfloat16), w_ref[...],
                       preferred_element_type=jnp.float32) + b_ref[...]
        a = a_ref[0, 0]
        h = jnp.where(feat >= 0.0, feat, a * feat)                  # PReLU, shared slope
        # F.normalize(h, dim=1): h * rsqrt(max(sumsq, eps^2))
        inv_norm = jax.lax.rsqrt(
            jnp.maximum(jnp.sum(h * h, axis=-1, keepdims=True), EPS * EPS))
        hn_ref[...] = (h * inv_norm).astype(hn_ref.dtype)


# ----------------------------------------------------------------------------
# Kernel 2: ArcMarginProduct cosine logits, tiled over the class dimension.
# Grid axis 0 = OUT tiles ("parallel").  Weight is pre-transposed (F, OUT) bf16;
# per-class inv-norm is applied to the small (B, TILE_N) output.
# ----------------------------------------------------------------------------
def _arcface_kernel(hn_ref, w_ref, invn_ref, out_ref):
    # hn_ref: (B, F) bf16   w_ref: (F, TILE_N) bf16
    # invn_ref: (1, TILE_N) f32   out_ref: (B, TILE_N) f32
    out_ref[...] = (jnp.dot(hn_ref[...], w_ref[...],
                            preferred_element_type=jnp.float32)
                    * invn_ref[...])


# ----------------------------------------------------------------------------
# Wrapper
# ----------------------------------------------------------------------------
def net_arcface_forward(x, params, *, tile_s=2048, tile_n=2048):
    B, C, H, W = x.shape
    HW = H * W

    w_bb = params["w_backbone"]    # (F, C)
    b_bb = params["b_backbone"]    # (1, F)
    prelu_a = params["prelu_a"]    # (1, 1)
    w_arc = params["w_arcface"]    # (OUT, F)

    F_dim = w_bb.shape[0]
    OUT = w_arc.shape[0]

    # One-time layout plumbing (outside the kernels): K-contracting layouts,
    # MXU-side weights stored/streamed in bf16.
    w_bb_t = w_bb.T.astype(jnp.bfloat16)                      # (C, F) bf16
    b_bb = b_bb.astype(jnp.float32)
    w_arc_t = w_arc.T.astype(jnp.bfloat16)                    # (F, OUT) bf16

    # Per-class inverse norm from the bf16 values actually fed to the MXU.
    w_sq = jnp.sum(jnp.square(w_arc_t.astype(jnp.float32)), axis=0, keepdims=True)
    inv_wnorm = jax.lax.rsqrt(jnp.maximum(w_sq, EPS * EPS))   # (1, OUT) f32

    # --- spatial tiling: NO whole-array pad of x; ragged tail masked in-kernel ---
    hw_align = pl.cdiv(HW, 128) * 128
    tile_s_eff = max(128, (min(tile_s, hw_align) // 128) * 128)
    num_k = pl.cdiv(HW, tile_s_eff)
    x3 = x.reshape(B, C, HW)                                  # native dtype, no cast

    # --- batch blocking (leading "parallel" axis for megacore / v7x 2-TC) ---
    tile_b = 8 if (B > 8 and B % 8 == 0) else B
    num_b = B // tile_b

    # --- class-dim tiling (multiple of 128, lane-dense stores) ---
    out_align = pl.cdiv(OUT, 128) * 128
    tile_n_eff = max(128, (min(tile_n, out_align) // 128) * 128)
    out_pad = pl.cdiv(OUT, tile_n_eff) * tile_n_eff
    num_j = out_pad // tile_n_eff
    if out_pad != OUT:
        # One-time (weight-sized) pad; zero columns * zero inv_wnorm -> 0 logits.
        w_arc_t = jnp.pad(w_arc_t, ((0, 0), (0, out_pad - OUT)))
        inv_wnorm = jnp.pad(inv_wnorm, ((0, 0), (0, out_pad - OUT)))

    cp_k1 = pltpu.CompilerParams(
        dimension_semantics=("parallel", "arbitrary"),
        vmem_limit_bytes=32 * 1024 * 1024)
    cp_k2 = pltpu.CompilerParams(
        dimension_semantics=("parallel",),
        vmem_limit_bytes=32 * 1024 * 1024)

    # Kernel 1: backbone stand-in + PReLU + normalize -> hn (B, F) bf16.
    hn = pl.pallas_call(
        functools.partial(_backbone_head_kernel, hw=HW, tile_s=tile_s_eff),
        out_shape=jax.ShapeDtypeStruct((B, F_dim), jnp.bfloat16),
        grid=(num_b, num_k),
        in_specs=[
            pl.BlockSpec((tile_b, C, tile_s_eff), lambda b, k: (b, 0, k)),
            pl.BlockSpec((C, F_dim), lambda b, k: (0, 0)),
            pl.BlockSpec((1, F_dim), lambda b, k: (0, 0)),
            pl.BlockSpec(memory_space=pltpu.MemorySpace.SMEM),
        ],
        out_specs=pl.BlockSpec((tile_b, F_dim), lambda b, k: (b, 0)),
        scratch_shapes=[pltpu.VMEM((tile_b, C, 128), jnp.float32)],
        compiler_params=cp_k1,
    )(x3, w_bb_t, b_bb, prelu_a)

    # Kernel 2: cosine logits, streaming the bf16 ArcFace weight over OUT tiles.
    logits_pad = pl.pallas_call(
        _arcface_kernel,
        out_shape=jax.ShapeDtypeStruct((B, out_pad), jnp.float32),
        grid=(num_j,),
        in_specs=[
            pl.BlockSpec((B, F_dim), lambda j: (0, 0)),
            pl.BlockSpec((F_dim, tile_n_eff), lambda j: (0, j)),
            pl.BlockSpec((1, tile_n_eff), lambda j: (0, j)),
        ],
        out_specs=pl.BlockSpec((B, tile_n_eff), lambda j: (0, j)),
        compiler_params=cp_k2,
    )(hn, w_arc_t, inv_wnorm)

    return logits_pad[:, :OUT]


# ----------------------------------------------------------------------------
# Pure-JAX f32 reference (same math, no tiling / bf16) for correctness check.
# ----------------------------------------------------------------------------
def _reference_forward(x, params):
    B, C, H, W = x.shape
    pooled = jnp.mean(x.reshape(B, C, H * W).astype(jnp.float32), axis=-1)
    feat = pooled @ params["w_backbone"].T + params["b_backbone"]
    a = params["prelu_a"][0, 0]
    h = jnp.where(feat >= 0.0, feat, a * feat)
    hn = h / jnp.maximum(jnp.linalg.norm(h, axis=-1, keepdims=True), EPS)
    w = params["w_arcface"]
    wn = w / jnp.maximum(jnp.linalg.norm(w, axis=-1, keepdims=True), EPS)
    return hn @ wn.T


def init_params(key, in_channels, feat_dim, net_out_features):
    """Deterministic parameter construction (shapes follow the module's __init__)."""
    k1, k2, k3 = jax.random.split(key, 3)

    # Stand-in backbone linear: (F, C) weight + bias.
    bound_bb = math.sqrt(6.0 / (in_channels + feat_dim))
    w_backbone = jax.random.uniform(
        k1, (feat_dim, in_channels), jnp.float32, -bound_bb, bound_bb)
    b_backbone = jax.random.uniform(
        k2, (1, feat_dim), jnp.float32, -0.1, 0.1)

    # PReLU: num_parameters=1, PyTorch default init 0.25.
    prelu_a = jnp.full((1, 1), 0.25, jnp.float32)

    # ArcMarginProduct weight: (out_features, in_features), xavier_uniform.
    out_features = net_out_features + 1
    bound_arc = math.sqrt(6.0 / (feat_dim + out_features))
    w_arcface = jax.random.uniform(
        k3, (out_features, feat_dim), jnp.float32, -bound_arc, bound_arc)

    return {
        "w_backbone": w_backbone,
        "b_backbone": b_backbone,
        "prelu_a": prelu_a,
        "w_arcface": w_arcface,
    }


def _check(x, params, out_classes, tile_s, tile_n):
    logits = jax.block_until_ready(
        net_arcface_forward(x, params, tile_s=tile_s, tile_n=tile_n))
    ref = _reference_forward(x, params)
    assert logits.shape == (x.shape[0], out_classes), logits.shape
    assert bool(jnp.all(jnp.isfinite(logits)))
    # cosine logits must lie in [-1, 1] (small slack for bf16 MXU inputs)
    assert bool(jnp.all(jnp.abs(logits) <= 1.0 + 1e-2))
    # match the f32 reference (bf16 matmul inputs perturb at the ~1e-3 level)
    assert bool(jnp.all(jnp.abs(logits - ref) <= 2e-2))


if __name__ == "__main__":
    key = jax.random.PRNGKey(0)
    kx1, kx2, kx3, kp = jax.random.split(key, 4)

    C = 4
    FEAT_DIM = 32          # stand-in for the backbone's output feature dim
    NET_OUT_FEATURES = 1   # -> ArcFace produces net_out_features + 1 = 2 logits
    params = init_params(kp, C, FEAT_DIM, NET_OUT_FEATURES)

    # 1) Small NCHW input, spatial divides the tile (multi-step reduction).
    x1 = jax.random.normal(kx1, (2, C, 16, 16), jnp.float32)
    _check(x1, params, NET_OUT_FEATURES + 1, tile_s=128, tile_n=512)

    # 2) Ragged spatial extent (HW=210 not a multiple of 128) -> in-kernel mask path.
    x2 = jax.random.normal(kx2, (2, C, 14, 15), jnp.float32)
    _check(x2, params, NET_OUT_FEATURES + 1, tile_s=128, tile_n=2048)

    # 3) Larger batch -> exercises the "parallel" batch-block grid axis (tile_b=8).
    x3 = jax.random.normal(kx3, (16, C, 16, 16), jnp.float32)
    _check(x3, params, NET_OUT_FEATURES + 1, tile_s=128, tile_n=2048)

    print("KERNEL_OK")
</pallas_src>

<mosaic_0001>
module attributes {stable_mosaic.version = 11 : i64} {
  func.func @_backbone_head_kernel(%arg0: i32, %arg1: i32, %arg2: memref<2x4x128xf32, #tpu.memory_space<vmem>>, %arg3: memref<4x32xbf16, #tpu.memory_space<vmem>>, %arg4: memref<1x32xf32, #tpu.memory_space<vmem>>, %arg5: memref<1x1xf32, #tpu.memory_space<smem>>, %arg6: memref<2x32xbf16, #tpu.memory_space<vmem>>, %arg7: memref<2x4x128xf32, #tpu.memory_space<vmem>>) attributes {dimension_semantics = [#tpu.dimension_semantics<parallel>, #tpu.dimension_semantics<arbitrary>], iteration_bounds = array<i64: 1, 2>, scalar_prefetch = 0 : i64, scratch_operands = 1 : i64, tpu.core_type = #tpu.core_type<tc>, window_params = [{transform_indices = @transform_0, window_bounds = array<i64: 2, 4, 128>}, {pipeline_mode = #tpu.pipeline_mode<synchronous>, transform_indices = @transform_1, window_bounds = array<i64: 4, 32>}, {pipeline_mode = #tpu.pipeline_mode<synchronous>, transform_indices = @transform_2, window_bounds = array<i64: 1, 32>}, {transform_indices = @transform_3, window_bounds = array<i64: 1, 1>}, {transform_indices = @transform_4, window_bounds = array<i64: 2, 32>}]} {
    %c0_i32 = arith.constant 0 : i32
    %0 = arith.cmpi eq, %arg1, %c0_i32 : i32
    %1 = arith.extui %0 : i1 to i32
    %c0_i32_0 = arith.constant 0 : i32
    %2 = arith.cmpi ne, %1, %c0_i32_0 : i32
    scf.if %2 {
      %cst = arith.constant 0.000000e+00 : f32
      %10 = vector.broadcast %cst : f32 to vector<2x4x128xf32>
      %c0_10 = arith.constant 0 : index
      %c0_11 = arith.constant 0 : index
      %c0_12 = arith.constant 0 : index
      %11 = vector.load %arg7[%c0_10, %c0_11, %c0_12] : memref<2x4x128xf32, #tpu.memory_space<vmem>>, vector<2x4x128xf32>
      tpu.vector_store %arg7[%c0_10, %c0_11, %c0_12], %10 {strides = array<i32>} : memref<2x4x128xf32, #tpu.memory_space<vmem>>, vector<2x4x128xf32>,
    } else {
    }
    %c0 = arith.constant 0 : index
    %c0_1 = arith.constant 0 : index
    %c0_2 = arith.constant 0 : index
    %3 = vector.load %arg7[%c0, %c0_1, %c0_2] : memref<2x4x128xf32, #tpu.memory_space<vmem>>, vector<2x4x128xf32>
    %c0_3 = arith.constant 0 : index
    %c0_4 = arith.constant 0 : index
    %c0_5 = arith.constant 0 : index
    %4 = vector.load %arg2[%c0_3, %c0_4, %c0_5] : memref<2x4x128xf32, #tpu.memory_space<vmem>>, vector<2x4x128xf32>
    %5 = arith.addf %3, %4 : vector<2x4x128xf32>
    %c0_6 = arith.constant 0 : index
    %c0_7 = arith.constant 0 : index
    %c0_8 = arith.constant 0 : index
    %6 = vector.load %arg7[%c0_6, %c0_7, %c0_8] : memref<2x4x128xf32, #tpu.memory_space<vmem>>, vector<2x4x128xf32>
    tpu.vector_store %arg7[%c0_6, %c0_7, %c0_8], %5 {strides = array<i32>} : memref<2x4x128xf32, #tpu.memory_space<vmem>>, vector<2x4x128xf32>,
    %c1_i32 = arith.constant 1 : i32
    %7 = arith.cmpi eq, %arg1, %c1_i32 : i32
    %8 = arith.extui %7 : i1 to i32
    %c0_i32_9 = arith.constant 0 : i32
    %9 = arith.cmpi ne, %8, %c0_i32_9 : i32
    scf.if %9 {
      %c0_10 = arith.constant 0 : index
      %c0_11 = arith.constant 0 : index
      %c0_12 = arith.constant 0 : index
      %10 = vector.load %arg7[%c0_10, %c0_11, %c0_12] : memref<2x4x128xf32, #tpu.memory_space<vmem>>, vector<2x4x128xf32>
      %cst = arith.constant dense<0.000000e+00> : vector<2x4xf32>
      %11 = vector.multi_reduction <add>, %10, %cst [2] : vector<2x4x128xf32> to vector<2x4xf32>
      %cst_13 = arith.constant 3.906250e-03 : f32
      %12 = vector.broadcast %cst_13 : f32 to vector<2x4xf32>
      %13 = arith.mulf %11, %12 : vector<2x4xf32>
      %14 = arith.truncf %13 : vector<2x4xf32> to vector<2x4xbf16>
      %c0_14 = arith.constant 0 : index
      %c0_15 = arith.constant 0 : index
      %15 = vector.load %arg3[%c0_14, %c0_15] : memref<4x32xbf16, #tpu.memory_space<vmem>>, vector<4x32xbf16>
      %cst_16 = arith.constant dense<0.000000e+00> : vector<2x32xf32>
      %16 = tpu.matmul %14, %15, %cst_16 {dimension_numbers = #tpu.dot_dimension_numbers<[1], [0], [0], [1], [0, 0, 1, 1], [], []>} : vector<2x4xbf16>, vector<4x32xbf16>, vector<2x32xf32> -> vector<2x32xf32>
      %c0_17 = arith.constant 0 : index
      %c0_18 = arith.constant 0 : index
      %17 = vector.load %arg4[%c0_17, %c0_18] : memref<1x32xf32, #tpu.memory_space<vmem>>, vector<1x32xf32>
      %18 = vector.broadcast %17 : vector<1x32xf32> to vector<2x32xf32>
      %19 = arith.addf %16, %18 : vector<2x32xf32>
      %c0_19 = arith.constant 0 : index
      %c0_20 = arith.constant 0 : index
      %20 = memref.load %arg5[%c0_19, %c0_20] : memref<1x1xf32, #tpu.memory_space<smem>>
      %cst_21 = arith.constant 0.000000e+00 : f32
      %21 = vector.broadcast %cst_21 : f32 to vector<2x32xf32>
      %22 = arith.cmpf oge, %19, %21 : vector<2x32xf32>
      %23 = vector.broadcast %20 : f32 to vector<2x32xf32>
      %24 = arith.mulf %23, %19 : vector<2x32xf32>
      %25 = arith.select %22, %19, %24 : vector<2x32xi1>, vector<2x32xf32>
      %26 = arith.mulf %25, %25 : vector<2x32xf32>
      %cst_22 = arith.constant dense<0.000000e+00> : vector<2xf32>
      %27 = vector.multi_reduction <add>, %26, %cst_22 [1] : vector<2x32xf32> to vector<2xf32>
      %28 = vector.shape_cast %27 : vector<2xf32> to vector<2x1xf32>
      %cst_23 = arith.constant 1.000000e-24 : f32
      %29 = vector.broadcast %cst_23 : f32 to vector<2x1xf32>
      %30 = arith.maximumf %28, %29 : vector<2x1xf32>
      %31 = math.rsqrt %30 : vector<2x1xf32>
      %32 = vector.broadcast %31 : vector<2x1xf32> to vector<2x32xf32>
      %33 = arith.mulf %25, %32 : vector<2x32xf32>
      %34 = arith.truncf %33 : vector<2x32xf32> to vector<2x32xbf16>
      %c0_24 = arith.constant 0 : index
      %c0_25 = arith.constant 0 : index
      %35 = vector.load %arg6[%c0_24, %c0_25] : memref<2x32xbf16, #tpu.memory_space<vmem>>, vector<2x32xbf16>
      tpu.vector_store %arg6[%c0_24, %c0_25], %34 {strides = array<i32>} : memref<2x32xbf16, #tpu.memory_space<vmem>>, vector<2x32xbf16>,
    } else {
    }
    return
  }
  func.func @transform_0(%arg0: i32, %arg1: i32) -> (i32, i32, i32) {
    %c0_i32 = arith.constant 0 : i32
    %c0_i32_0 = arith.constant 0 : i32
    return %arg0, %c0_i32, %arg1 : i32, i32, i32
  }
  func.func @transform_1(%arg0: i32, %arg1: i32) -> (i32, i32) {
    %c0_i32 = arith.constant 0 : i32
    %c0_i32_0 = arith.constant 0 : i32
    %c0_i32_1 = arith.constant 0 : i32
    return %c0_i32, %c0_i32_0 : i32, i32
  }
  func.func @transform_2(%arg0: i32, %arg1: i32) -> (i32, i32) {
    %c0_i32 = arith.constant 0 : i32
    %c0_i32_0 = arith.constant 0 : i32
    %c0_i32_1 = arith.constant 0 : i32
    return %c0_i32, %c0_i32_0 : i32, i32
  }
  func.func @transform_3(%arg0: i32, %arg1: i32) -> (i32, i32) {
    %c0_i32 = arith.constant 0 : i32
    %c0_i32_0 = arith.constant 0 : i32
    %c0_i32_1 = arith.constant 0 : i32
    return %c0_i32, %c0_i32_0 : i32, i32
  }
  func.func @transform_4(%arg0: i32, %arg1: i32) -> (i32, i32) {
    %c0_i32 = arith.constant 0 : i32
    %c0_i32_0 = arith.constant 0 : i32
    return %arg0, %c0_i32 : i32, i32
  }
}

</mosaic_0001>

<bundles_post_ra>
// kernel: tpu_custom_call.1
= control target key start
LH: loop header
LB: loop body
LE: loop exit
PB: predicated region body
PF: predicated region fallthrough
CT: control target
= control target key end

     0   :  { %s820_s0 = inlined_call_operand.hbm [shape: f32[2,4,256], index: 0, kind: input, shape index: {}]   ;;  %s821_s1 = inlined_call_operand.vmem [shape: bf16[4,32], index: 1, kind: input, shape index: {}]   ;;  %s822_s2 = inlined_call_operand.vmem [shape: f32[1,32], index: 2, kind: input, shape index: {}]   ;;  %s823_s3 = inlined_call_operand.<no memory space> [shape: f32[1,1], index: 3, kind: input, shape index: {}]   ;;  %s824_s4 = inlined_call_operand.hbm [shape: bf16[2,32], index: 4, kind: output, shape index: {}]  }
   0x1   :  { %9 = sst [smem:[#allocation3]] %s823_s3 }
   0x2   :  { %10 = vsyncpa [#allocation5], 0 }
   0x3   :  { %12 = vsyncpa [#allocation5 + $0x1], 0 }
   0x4   :  { %13 = vsyncpa [#allocation6], 0  ;;  %s661_s17 = smov 0   ;;  %s663_s18 = smov 0  }
   0x5   :  { %s665_s19 = smov 0   ;;  %s667_s20 = smov 0  }
   0x6   :  { %s669_s21 = smov 0   ;;  %s671_s22 = smov 0  }
   0x7 LB: > { %s420_s3 = sadd.s32 4294967295, %s623_s22   ;;  %s28_s23 = sadd.s32 1, %s619_s21  ;;  %s623_s22 = sphi %s671_s22, %s19_s22   ;;  %s619_s21 = sphi %s669_s21, %s834_s21   ;;  %s615_s20 = sphi %s667_s20, %s833_s20   ;;  %s611_s19 = sphi %s665_s19, %s832_s19   ;;  %s607_s18 = sphi %s663_s18, %s831_s18   ;;  %s603_s17 = sphi %s661_s17, %s830_s17  }
   0x8   : > { %p29_p0 = scmp.ge.s32.totalorder %s28_s23, 2  ;;  %s40_s24 = sadd.s32 1, %s611_s19 }
   0x9   : > { %p47_p1 = scmp.ne.s32.totalorder %s611_s19, %s607_s18  ;;  %p48_p2 = scmp.eq.s32.totalorder %s623_s22, 0 }
   0xa   : > { %s836_s23 = smov (%p29_p0, %s28_s23), 0  ;;  %p53_p4 = scmp.ne.s32.totalorder %s607_s18, %s603_s17 }
   0xb   : > { %p697_p3 = por %p48_p2, %p47_p1  ;;  %s36_s26 = ssub.s32 %s619_s21, %s836_s23 }
   0xc   : > { %p54_p5 = scmp.eq.s32.totalorder %s420_s3, 0  ;;  %p38_p6 = scmp.eq.s32.totalorder %s36_s26, 0 }
   0xd   : > { %p453_p8 = scmp.lt.s32.totalorder %s623_s22, 2  ;;  %s175_s29 = sand.u32 1, %s611_s19  }
   0xe   : > { %p706_p7 = por %p54_p5, %p53_p4  ;;  %s424_s30 = sshll.u32 %s619_s21, 6 }
   0xf   : > { %s712_s28 = scalar_select %p38_p6, %s611_s19, %s40_s24  }
  0x10   : > { %s423_s5 = sshll.u32 %s175_s29, 3  ;;  %s719_s8 = scalar_lea.hbm %s820_s0, %s424_s30 }
  0x11   : > { %s179_s9 = scalar_lea.vmem [#allocation4], %s423_s5  ;;  %p723_p9 = pnand %p453_p8, %p697_p3 }
  0x12   : > { %s188_s10 = sshll.u32 %s179_s9, 4  ;;  %s730_s12 = scalar_lea.sflag [#allocation5], %s175_s29  ;;  %s727_s10 = int_to_ptr.vmem [resolvable:$true] %s188_s10 }
  0x13   : > { %s513_s13 = scalar_lea.hbm %s719_s8, 128  ;;  %p515_p12 = pneg %p723_p9 }
  0x14   : > { %p514_p11 = scmp.ne.s32.totalorder %s719_s8, %s513_s13  ;;  %s518_s16 = scalar_lea.hbm %s820_s0, 256 }
  0x15   : > { %p519_p1 = scmp.lt.u32.totalorder %s719_s8, %s820_s0  ;;  %p520_p2 = scmp.lt.u32.totalorder %s518_s16, %s513_s13 }
  0x16   : > { %p516_p13 = pnand %p515_p12, %p514_p11  ;;  %p522_p4 = scmp.lt.u32.totalorder %s513_s13, %s719_s8 }
  0x17   : > { %p521_p3 = por %p520_p2, %p519_p1 }
  0x18   : > { %p517_p0 = pneg %p516_p13 }
  0x19   : > { %p523_p5 = por %p522_p4, %p521_p3 }
  0x1b   : > { %p524_p6 = pnand %p523_p5, %p517_p0 }
  0x1d   : > { %527 = shalt.err (!%p524_p6)
}
  0x1e   : > { %s528_s25 = scalar_lea.vmem %s727_s10, 128  ;;  %s625_s26 = smov [#allocation4]  }
  0x1f   : > { %p529_p8 = scmp.ne.s32.totalorder %s727_s10, %s528_s25  ;;  %s533_s29 = sshll.u32 %s625_s26, 4  ;;  %s534_s29 = int_to_ptr.vmem [resolvable:$false] %s533_s29 }
  0x20   : > { %s535_s30 = scalar_lea.vmem %s534_s29, 256  ;;  %p536_p10 = scmp.lt.s32.totalorder %s727_s10, %s534_s29 }
  0x21   : > { %p531_p11 = pnand %p529_p8, %p515_p12  ;;  %p537_p1 = scmp.lt.s32.totalorder %s535_s30, %s528_s25 }
  0x23   : > { %p532_p13 = pneg %p531_p11  ;;  %p538_p2 = por %p537_p1, %p536_p10 }
  0x25   : > { %p539_p3 = pnand %p538_p2, %p532_p13 }
  0x27   : > { %542 = shalt.err (!%p539_p3)
}
  0x28   : > { %s626_s5 = smov 128   ;;  %s627_s6 = smov 64  }
  0x29   : > { %s628_s7 = smov 4   ;;  %p196_p12 = scmp.lt.s32.totalorder %s623_s22, 3 }
  0x2a   : > { %452 = dma.hbm_to_vmem [thread:$0]  (!%p723_p9), %s719_s8, 128, %s727_s10, %s730_s12, %s626_s5, %s627_s6, %s628_s7  }
  0x2b   : > { %p828_p0 = scmp.ge.s32.totalorder %s623_s22, 1 }
  0x2d   : > { %p197_p4 = pnand %p828_p0, %p196_p12 }
  0x2e   : > { %s202_s9 = sand.u32 (!%p197_p4), 1, %s607_s18  }
  0x2f   : > { %200 = sbr.rel (%p197_p4) target bundleno = 638 (0x27e), region = 36  ;;  %s426_s13 = sshll.u32 (!%p197_p4), %s202_s9, 3 }
  0x30   : > { %s203_s14 = scalar_lea.sflag (!%p197_p4), [#allocation5], %s202_s9  ;;  %s206_s15 = scalar_lea.vmem (!%p197_p4), [#allocation4], %s426_s13 }
  0x36   : > { %594 = dma.done.wait (%p706_p7), %s203_s14, 128  }
  0x37   : > { %596 = vsyncadd (%p706_p7), %s203_s14, 4294967168  ;;  %p427_p10 = scmp.ne.s32.totalorder %s615_s20, 0 }
  0x38   : > { %v629_v0 = vmov (!%p427_p10), 0.0  }
  0x39   : > { %231 = sbr.rel (%p427_p10) target bundleno = 64 (0x40), region = 44  ;;  %232 = vst [vmem:[#allocation2] sm:$0xf] (!%p427_p10), %v629_v0  ;;  %233 = vst [vmem:[#allocation2 + $0x4] sm:$0xf] (!%p427_p10), %v629_v0 }
  0x40 PF: > { %v234_v1 = vld [vmem:[#allocation2] sm:$0xf]  ;;  %v236_v2 = vld [vmem:[%s206_s15] sm:$0xf]  ;;  %v235_v3 = vld [vmem:[#allocation2 + $0x4] sm:$0xf] }
  0x41   : > { %v238_v4 = vadd.f32 %v236_v2, %v234_v1  ;;  %v237_v5 = vld [vmem:[%s206_s15 + $0x4] sm:$0xf]  ;;  %p428_p9 = scmp.ne.s32.totalorder %s615_s20, 1 }
  0x42   : > { %v239_v6 = vadd.f32 %v237_v5, %v235_v3  ;;  %vm248_vm0 = vcmask (!%p428_p9), 1043456   ;;  %v259_v11 = vld [vmem:[%s821_s1] sm:$0x3] (!%p428_p9)  ;;  %vm288_vm1 = vcmask (!%p428_p9), 1041408   ;;  %v630_v12 = vmov (!%p428_p9), 0.0   ;;  %s332_s20 = sld [smem:[#allocation3]] (!%p428_p9) }
  0x43   : > { %240 = vst [vmem:[#allocation2] sm:$0xf] %v238_v4  ;;  %245 = sbr.rel (%p428_p9) target bundleno = 613 (0x265), region = 48  ;;  %437 = vmatprep.subr.bf16.mxu0 (!%p428_p9), %v630_v12  ;;  %v290_v13 = vsel (!%p428_p9), %vm288_vm1, %v259_v11, 0  ;;  %vm631_vm2 = vmmov (!%p428_p9), 0   ;;  %v271_v14 = vlaneseq (!%p428_p9)  ;;  %vm281_vm3 = vcmask (!%p428_p9), 1041409  }
  0x44   : > { %241 = vst [vmem:[#allocation2 + $0x4] sm:$0xf] %v239_v6  ;;  %438 = vmatpush3.bf16.msra.mxu0 (!%p428_p9), %v290_v13  ;;  %439 = vmatprep.mubr.msk.bf16.mxu0 (!%p428_p9), %vm631_vm2, %v630_v12  ;;  %vm284_vm4 = vcmask (!%p428_p9), 31744   ;;  %v429_v30 = vld [vmem:[%s822_s2] ss:$0 sm:$0xff] (!%p428_p9)  ;;  %vm338_vm6 = vcmask (!%p428_p9), 254976  }
  0x45   : > { %v272_v17 = vand.u32 (!%p428_p9), 127, %v271_v14  ;;  %v274_v18 = vshrl.u32 (!%p428_p9), %v271_v14, 7  ;;  %vm346_vm7 = vcmask (!%p428_p9), 253952  }
  0x47   : > { %v275_v22 = vsub.s32 (!%p428_p9), %v272_v17, %v274_v18 }
  0x48   : > { %v334_v32 = vstv (!%p428_p9), %s332_s20 }
  0x4a   : > { %v246_v7 = vld [vmem:[#allocation2] sm:$0xf] }
  0x4b   : > { %v247_v8 = vld [vmem:[#allocation2 + $0x4] sm:$0xf]  ;;  %v249_v9 = vsel %vm248_vm0, %v246_v7, 0.0 }
  0x4c   : > { %250 = vadd.xlane.f32.xlu0 %v249_v9  ;;  %v252_v10 = vsel %vm248_vm0, %v247_v8, 0.0 }
  0x50   : > { %253 = vadd.xlane.f32.xlu0 %v252_v10 }
  0xd9   : > { %v251_v15 = vpop.xlane.xlu0 %250 }
  0xda   : > { %v255_v16 = vmul.f32 0.00390625, %v251_v15 }
  0xdc   : > { %v257_v19 = vpack.c.bf16 %v255_v16, %v255_v16 }
  0xdd   : > { %v254_v20 = vpop.xlane.xlu0 %253 }
  0xde   : > { %v256_v21 = vmul.f32 0.00390625, %v254_v20  ;;  %v269_v23 = vunpack.c.l.b16 %v257_v19 }
  0xe0   : > { %v258_v24 = vpack.c.bf16 %v256_v21, %v256_v21  ;;  %v276_v26 = vrot.slane %v269_v23, %v275_v22 }
  0xe2   : > { %v270_v25 = vunpack.c.l.b16 %v258_v24 }
  0xe4   : > { %v280_v27 = vrot.slane %v270_v25, %v275_v22 }
  0xe6   : > { %v282_v28 = vsel %vm281_vm3, %v280_v27, %v276_v26 }
  0xe7   : > { %v283_v29 = vpack.c.b16 %v282_v28, %v282_v28 }
  0xe9   : > { %440 = vmatmul.mubr.msk.bf16.vlgmr.msra.gmra.mrb[0].mxu0 %vm284_vm4, %v283_v29 }
 0x1bc   : > { %v326_v31 = vpop.f32.mrb[0].mxu0 }
 0x1bd   : > { %v327_v33 = vadd.f32 %v429_v30, %v326_v31  ;;  %v441_v34 = vpop.f32.mrb[1].mxu0 }
 0x1be   : > { %v329_v35 = vpop.f32.mrb[2].mxu0 }
 0x1bf   : > { %v335_v36 = vmul.f32 %v334_v32, %v327_v33  ;;  %v442_v37 = vpop.f32.mrb[3].mxu0  ;;  %vm333_vm5 = vcmp.ge.f32.partialorder %v327_v33, 0.0 }
 0x1c1   : > { %v336_v38 = vsel %vm333_vm5, %v327_v33, %v335_v36 }
 0x1c2   : > { %v337_v39 = vmul.f32 %v336_v38, %v336_v38 }
 0x1c4   : > { %v339_v40 = vsel %vm338_vm6, %v337_v39, 0.0 }
 0x1c5   : > { %340 = vadd.xlane.f32.xlu1 %v339_v40 }
 0x252   : > { %v341_v41 = vpop.xlane.xlu1 %340 }
 0x253   : > { %v342_v42 = vmax.f32 %v341_v41, 1e-24 }
 0x255   : > { %511 = vrsqrt.f32 %v342_v42 }
 0x25f   : > { %v512_v43 = vpop.eup %511 }
 0x260   : > { %v344_v44 = vmul.f32 %v512_v43, %v336_v38 }
 0x262   : > { %v345_v45 = vpack.c.bf16 %v344_v44, %v344_v44 }
 0x264   : > { %347 = vst.msk [vmem:[#allocation7] sm:$0x1] %vm346_vm7, %v345_v45 }
 0x265 PF: > { %p776_p7 = scmp.eq.s32.totalorder %s420_s3, 1  ;;  %s632_s16 = smov [#allocation7]  }
 0x266   : > { %s357_s17 = sshll.u32 %s632_s16, 4  ;;  %s358_s17 = int_to_ptr.vmem [resolvable:$true] %s357_s17 }
 0x267   : > { %s543_s24 = scalar_lea.vmem %s358_s17, 16  ;;  %s549_s25 = scalar_lea.vmem %s358_s17, 32 }
 0x268   : > { %p544_p5 = scmp.ne.s32.totalorder %s358_s17, %s543_s24  ;;  %p550_p11 = scmp.lt.s32.totalorder %s358_s17, %s358_s17 }
 0x269   : > { %p551_p13 = scmp.lt.s32.totalorder %s549_s25, %s543_s24 }
 0x26a   : > { %p545_p6 = pnand %p544_p5, %p776_p7 }
 0x26b   : > { %p552_p1 = por %p551_p13, %p550_p11 }
 0x26c   : > { %p546_p8 = pneg %p545_p6 }
 0x26e   : > { %p553_p2 = pnand %p552_p1, %p546_p8 }
 0x270   : > { %556 = shalt.err (!%p553_p2)
}
 0x271   : > { %s557_s29 = scalar_lea.hbm %s824_s4, 16 }
 0x272   : > { %p558_p3 = scmp.ne.s32.totalorder %s824_s4, %s557_s29  ;;  %p563_p4 = scmp.lt.u32.totalorder %s557_s29, %s824_s4 }
 0x274   : > { %p559_p12 = pnand %p558_p3, %p776_p7 }
 0x276   : > { %p560_p0 = pneg %p559_p12 }
 0x278   : > { %p565_p10 = pnand %p563_p4, %p560_p0 }
 0x27a   : > { %568 = shalt.err (!%p565_p10)
}
 0x27b   : > { %446 = dma.vmem_to_hbm [thread:$0]  (%p776_p7), %s358_s17, 16, %s824_s4, [#allocation6]  }
 0x27c   : > { %598 = dma.done.wait (%p776_p7), [#allocation6], 16  }
 0x27d   : > { %600 = vsyncadd (%p776_p7), [#allocation6], 4294967280 }
 0x27e PF: > { %s19_s22 = sadd.s32 1, %s623_s22   ;;  %s830_s17 = smov %s607_s18 }
 0x27f   : > { %p16_p9 = scmp.ge.s32.totalorder %s19_s22, 4   ;;  %s831_s18 = smov %s611_s19 }
 0x280   : > { %s832_s19 = smov %s712_s28  ;;  %s833_s20 = smov %s619_s21 }
 0x281   : > { %s834_s21 = smov %s836_s23  ;;  %18 = sbr.rel (!%p16_p9) target bundleno = 7 (0x7), region = 82 }
 0x288   :  { %370 = vsyncpa [#allocation5], 1 }
 0x289   :  { %372 = vsyncpa [#allocation5 + $0x1], 1 }
 0x28a   :  { %373 = vsyncpa [#allocation6], 1 }
 0x28b   :  { %375 = vsyncpa [#allocation6 + $0x1], 1 }

</bundles_post_ra>
